<compile_context>
chip_gen: v7x
topology: tpu7x:2x2x1
jax: 0.10.0
libtpu: 0.0.40
codegen_flags: <defaults>
</compile_context>

<pallas_src>
import jax
import jax.numpy as jnp
from jax import lax
from jax.experimental import pallas as pl
from jax.experimental.pallas import tpu as pltpu

# ---------------- model hyper-parameters (consistent with the module) -------
INPUT_DIM = 8        # input_dims = (8,)
FC1_DIMS = 32
FC2_DIMS = 32
N_OUT = 2
BATCH = 2
MAX_LINEAR = 0.25
MAX_ANGULAR = 0.5
LN_EPS = 1e-5

# ---------------- kernel layout constants ------------------------------------
F = 128              # lane width for hidden activations / weight columns
USE_BF16_MATMUL = False

# Trimmed packed parameter slab ([SLAB_ROWS, F], f32):
#   rows [ 0: 8) : W1  [INPUT_DIM, F]  (cols >= 32 zero)
#   rows [ 8:40) : W2  [FC1_DIMS,  F]  (cols >= 32 zero)
#   rows [40:72) : WMU [FC2_DIMS,  F]  (col 0 pre-scaled by 0.5, cols >= 2 zero)
#   row 72: b1  73: g1  74: be1  75: b2  76: g2  77: be2
#   row 78: bmu (col 0 pre-scaled by 0.5)
#   row 79: out_scale   80: out_offset
#   rows 81..87 : zero padding (row count multiple of 8)
W1_R0 = 0
W2_R0 = W1_R0 + INPUT_DIM          # 8
WMU_R0 = W2_R0 + FC1_DIMS          # 40
VEC_R0 = WMU_R0 + FC2_DIMS         # 72
SLAB_ROWS = ((VEC_R0 + 9 + 7) // 8) * 8   # 88


def actor_kernel(x_ref, p_ref, out_ref):
    x = x_ref[...]                                    # [TILE_B, INPUT_DIM] f32

    w1 = p_ref[W1_R0:W1_R0 + INPUT_DIM, :]            # [8,  F]
    w2 = p_ref[W2_R0:W2_R0 + FC1_DIMS, :]             # [32, F]
    wmu = p_ref[WMU_R0:WMU_R0 + FC2_DIMS, :]          # [32, F]
    b1 = p_ref[VEC_R0 + 0:VEC_R0 + 1, :]
    g1 = p_ref[VEC_R0 + 1:VEC_R0 + 2, :]
    be1 = p_ref[VEC_R0 + 2:VEC_R0 + 3, :]
    b2 = p_ref[VEC_R0 + 3:VEC_R0 + 4, :]
    g2 = p_ref[VEC_R0 + 4:VEC_R0 + 5, :]
    be2 = p_ref[VEC_R0 + 5:VEC_R0 + 6, :]
    bmu = p_ref[VEC_R0 + 6:VEC_R0 + 7, :]
    scale = p_ref[VEC_R0 + 7:VEC_R0 + 8, :]
    offset = p_ref[VEC_R0 + 8:VEC_R0 + 9, :]

    if USE_BF16_MATMUL:
        cast = lambda a: a.astype(jnp.bfloat16)
    else:
        cast = lambda a: a

    def ln_relu(h, gamma, beta, inv_n):
        # Padded lanes of h are exactly zero, so lane-sums over all 128 lanes
        # equal sums over the real features; one pass: var = E[x^2] - mean^2.
        s = jnp.sum(h, axis=-1, keepdims=True)
        s2 = jnp.sum(h * h, axis=-1, keepdims=True)
        mean = s * inv_n
        var = s2 * inv_n - mean * mean
        y = (h - mean) * lax.rsqrt(var + LN_EPS) * gamma + beta
        # gamma/beta are zero on padded lanes -> padded lanes stay exactly 0.
        return jnp.maximum(y, 0.0)

    # fc1 -> LayerNorm -> ReLU      (contracts over the real K = 8)
    h1 = jnp.dot(cast(x), cast(w1), preferred_element_type=jnp.float32) + b1
    h1 = ln_relu(h1, g1, be1, 1.0 / FC1_DIMS)

    # fc2 -> LayerNorm -> ReLU      (contracts over the real K = 32)
    h2 = jnp.dot(cast(h1[:, :FC1_DIMS]), cast(w2),
                 preferred_element_type=jnp.float32) + b2
    h2 = ln_relu(h2, g2, be2, 1.0 / FC2_DIMS)

    # fused heads: col 0 = 0.5*mu_linear, col 1 = mu_angular, cols >= 2 zero.
    mu = jnp.dot(cast(h2[:, :FC2_DIMS]), cast(wmu),
                 preferred_element_type=jnp.float32) + bmu
    # col 0: 0.5*ML*(tanh(0.5*z)+1) == ML*sigmoid(z); col 1: MA*tanh(z).
    # Single transcendental, no iota/where; only the 2 real lanes are stored.
    y = jnp.tanh(mu) * scale + offset
    out_ref[...] = y[:, :N_OUT].astype(out_ref.dtype)


def _tiling(batch):
    """Pick (tile, padded_batch): 8-row pad for tiny (action-selection) batches,
    >=2 parallel grid steps for training batches (v7x megacore), cap tile=128."""
    b8 = ((batch + 7) // 8) * 8
    if b8 <= 8:
        tile = 8
    elif b8 <= 256:
        tile = max(8, ((b8 // 2 + 7) // 8) * 8)
    else:
        tile = 128
    b_pad = ((b8 + tile - 1) // tile) * tile
    return tile, b_pad


@jax.jit
def actor_forward(state, packed_params):
    B = state.shape[0]
    tile, b_pad = _tiling(B)

    x = state.astype(jnp.float32)
    if b_pad != B:
        x = jnp.pad(x, ((0, b_pad - B), (0, 0)))      # batch pad only; no lane pad

    grid = (b_pad // tile,)
    cost = pl.CostEstimate(
        flops=2 * b_pad * (INPUT_DIM * FC1_DIMS
                           + FC1_DIMS * FC2_DIMS
                           + FC2_DIMS * N_OUT),
        transcendentals=b_pad * (2 + N_OUT),           # 2 rsqrt + tanh lanes
        bytes_accessed=(x.size + packed_params.size + b_pad * N_OUT) * 4,
    )

    out = pl.pallas_call(
        actor_kernel,
        out_shape=jax.ShapeDtypeStruct((b_pad, N_OUT), jnp.float32),
        grid=grid,
        in_specs=[
            # state tile: last dim equals the full array dim (8) -> legal block
            pl.BlockSpec((tile, INPUT_DIM), lambda i: (i, 0)),
            # constant-index param slab: single buffer (no dead double-buffer)
            pl.BlockSpec((SLAB_ROWS, F), lambda i: (0, 0),
                         pipeline_mode=pl.Buffered(1)),
        ],
        # narrow output block (full trailing dim of 2): 64x less HBM writeback
        out_specs=pl.BlockSpec((tile, N_OUT), lambda i: (i, 0)),
        compiler_params=pltpu.CompilerParams(
            dimension_semantics=("parallel",)),
        cost_estimate=cost,
    )(x, packed_params)

    return out if b_pad == B else out[:B]


# ---------------- parameter construction / packing --------------------------
def init_params(key):
    """Deterministic init matching the PyTorch module's __init__ ranges."""
    k = jax.random.split(key, 8)
    f1 = 1.0 / jnp.sqrt(FC1_DIMS)      # fc1.weight.size()[0] == fc1_dims
    f2 = 1.0 / jnp.sqrt(FC2_DIMS)      # fc2.weight.size()[0] == fc2_dims
    f3 = 0.003

    # weights stored [in, out] (transpose of torch's [out, in])
    w1 = jax.random.uniform(k[0], (INPUT_DIM, FC1_DIMS), jnp.float32, -f1, f1)
    b1 = jax.random.uniform(k[1], (1, FC1_DIMS), jnp.float32, -f1, f1)
    w2 = jax.random.uniform(k[2], (FC1_DIMS, FC2_DIMS), jnp.float32, -f2, f2)
    b2 = jax.random.uniform(k[3], (1, FC2_DIMS), jnp.float32, -f2, f2)

    # LayerNorm affine params: default torch init (ones / zeros)
    g1 = jnp.ones((1, FC1_DIMS), jnp.float32)
    be1 = jnp.zeros((1, FC1_DIMS), jnp.float32)
    g2 = jnp.ones((1, FC2_DIMS), jnp.float32)
    be2 = jnp.zeros((1, FC2_DIMS), jnp.float32)

    # fused mu heads: column 0 = mu_linear, column 1 = mu_angular
    wl = jax.random.uniform(k[4], (FC2_DIMS, 1), jnp.float32, -f3, f3)
    bl = jax.random.uniform(k[5], (1, 1), jnp.float32, -f3, f3)
    wa = jax.random.uniform(k[6], (FC2_DIMS, 1), jnp.float32, -f3, f3)
    ba = jax.random.uniform(k[7], (1, 1), jnp.float32, -f3, f3)
    wmu = jnp.concatenate([wl, wa], axis=1)          # [FC2, 2]
    bmu = jnp.concatenate([bl, ba], axis=1)          # [1, 2]

    return (w1, b1, g1, be1, w2, b2, g2, be2, wmu, bmu)


def pack_params(params):
    """Pack all parameters into one trimmed lane-dense [SLAB_ROWS, F] f32 slab."""
    (w1, b1, g1, be1, w2, b2, g2, be2, wmu, bmu) = params
    # Fold the 0.5 pre-scale (sigmoid(x) = 0.5*(tanh(0.5*x)+1)) into the
    # mu_linear column of the fused head.
    wmu_s = wmu.at[:, 0].multiply(0.5)
    bmu_s = bmu.at[0, 0].multiply(0.5)

    slab = jnp.zeros((SLAB_ROWS, F), jnp.float32)
    slab = slab.at[W1_R0:W1_R0 + INPUT_DIM, :FC1_DIMS].set(w1)
    slab = slab.at[W2_R0:W2_R0 + FC1_DIMS, :FC2_DIMS].set(w2)
    slab = slab.at[WMU_R0:WMU_R0 + FC2_DIMS, :N_OUT].set(wmu_s)

    r = VEC_R0
    slab = slab.at[r + 0, :FC1_DIMS].set(b1[0])
    slab = slab.at[r + 1, :FC1_DIMS].set(g1[0])
    slab = slab.at[r + 2, :FC1_DIMS].set(be1[0])
    slab = slab.at[r + 3, :FC2_DIMS].set(b2[0])
    slab = slab.at[r + 4, :FC2_DIMS].set(g2[0])
    slab = slab.at[r + 5, :FC2_DIMS].set(be2[0])
    slab = slab.at[r + 6, :N_OUT].set(bmu_s[0])
    slab = slab.at[r + 7, 0].set(0.5 * MAX_LINEAR)   # out_scale
    slab = slab.at[r + 7, 1].set(MAX_ANGULAR)
    slab = slab.at[r + 8, 0].set(0.5 * MAX_LINEAR)   # out_offset
    return slab


# ---------------- pure-JAX reference (original unpadded math) ---------------
def _layernorm_ref(x, gamma, beta):
    mu = jnp.mean(x, axis=-1, keepdims=True)
    var = jnp.mean(jnp.square(x - mu), axis=-1, keepdims=True)
    return (x - mu) * lax.rsqrt(var + LN_EPS) * gamma + beta


def reference_forward(state, params):
    (w1, b1, g1, be1, w2, b2, g2, be2, wmu, bmu) = params
    h1 = jnp.maximum(_layernorm_ref(state @ w1 + b1, g1, be1), 0.0)
    h2 = jnp.maximum(_layernorm_ref(h1 @ w2 + b2, g2, be2), 0.0)
    mu = h2 @ wmu + bmu
    lin = jax.nn.sigmoid(mu[:, :1]) * MAX_LINEAR
    ang = jnp.tanh(mu[:, 1:]) * MAX_ANGULAR
    return jnp.concatenate([lin, ang], axis=1)


if __name__ == "__main__":
    key = jax.random.PRNGKey(0)
    pkey, xkey, xkey2 = jax.random.split(key, 3)
    params = init_params(pkey)
    packed = pack_params(params)

    # Small action-selection batch (B=2 -> padded to 8 rows, grid of 1).
    state = jax.random.normal(xkey, (BATCH, INPUT_DIM), jnp.float32)
    out = jax.block_until_ready(actor_forward(state, packed))
    ref = reference_forward(state, params)
    assert out.shape == (BATCH, N_OUT), out.shape
    assert jnp.allclose(out, ref, atol=1e-4, rtol=1e-4), (out, ref)

    # Training-style batch (B=96 -> tile 48, 2 parallel grid steps).
    state2 = jax.random.normal(xkey2, (96, INPUT_DIM), jnp.float32)
    out2 = jax.block_until_ready(actor_forward(state2, packed))
    ref2 = reference_forward(state2, params)
    assert out2.shape == (96, N_OUT), out2.shape
    assert jnp.allclose(out2, ref2, atol=1e-4, rtol=1e-4)

    print("KERNEL_OK")
</pallas_src>

<mosaic_0001>
module attributes {stable_mosaic.version = 11 : i64} {
  func.func @actor_kernel(%arg0: i32, %arg1: memref<8x8xf32, #tpu.memory_space<vmem>>, %arg2: memref<88x128xf32, #tpu.memory_space<vmem>>, %arg3: memref<8x2xf32, #tpu.memory_space<vmem>>) attributes {dimension_semantics = [#tpu.dimension_semantics<parallel>], iteration_bounds = array<i64: 1>, scalar_prefetch = 0 : i64, scratch_operands = 0 : i64, tpu.core_type = #tpu.core_type<tc>, window_params = [{transform_indices = @transform_0, window_bounds = array<i64: 8, 8>}, {pipeline_mode = #tpu.pipeline_mode<synchronous>, transform_indices = @transform_1, window_bounds = array<i64: 88, 128>}, {transform_indices = @transform_2, window_bounds = array<i64: 8, 2>}]} {
    %c0 = arith.constant 0 : index
    %c0_0 = arith.constant 0 : index
    %0 = vector.load %arg1[%c0, %c0_0] : memref<8x8xf32, #tpu.memory_space<vmem>>, vector<8x8xf32>
    %c0_1 = arith.constant 0 : index
    %c0_2 = arith.constant 0 : index
    %1 = vector.load %arg2[%c0_1, %c0_2] : memref<88x128xf32, #tpu.memory_space<vmem>>, vector<8x128xf32>
    %c8 = arith.constant 8 : index
    %c0_3 = arith.constant 0 : index
    %2 = vector.load %arg2[%c8, %c0_3] : memref<88x128xf32, #tpu.memory_space<vmem>>, vector<32x128xf32>
    %c40 = arith.constant 40 : index
    %c0_4 = arith.constant 0 : index
    %3 = vector.load %arg2[%c40, %c0_4] : memref<88x128xf32, #tpu.memory_space<vmem>>, vector<32x128xf32>
    %c72 = arith.constant 72 : index
    %c0_5 = arith.constant 0 : index
    %4 = vector.load %arg2[%c72, %c0_5] : memref<88x128xf32, #tpu.memory_space<vmem>>, vector<1x128xf32>
    %c73 = arith.constant 73 : index
    %c0_6 = arith.constant 0 : index
    %5 = vector.load %arg2[%c73, %c0_6] : memref<88x128xf32, #tpu.memory_space<vmem>>, vector<1x128xf32>
    %c74 = arith.constant 74 : index
    %c0_7 = arith.constant 0 : index
    %6 = vector.load %arg2[%c74, %c0_7] : memref<88x128xf32, #tpu.memory_space<vmem>>, vector<1x128xf32>
    %c75 = arith.constant 75 : index
    %c0_8 = arith.constant 0 : index
    %7 = vector.load %arg2[%c75, %c0_8] : memref<88x128xf32, #tpu.memory_space<vmem>>, vector<1x128xf32>
    %c76 = arith.constant 76 : index
    %c0_9 = arith.constant 0 : index
    %8 = vector.load %arg2[%c76, %c0_9] : memref<88x128xf32, #tpu.memory_space<vmem>>, vector<1x128xf32>
    %c77 = arith.constant 77 : index
    %c0_10 = arith.constant 0 : index
    %9 = vector.load %arg2[%c77, %c0_10] : memref<88x128xf32, #tpu.memory_space<vmem>>, vector<1x128xf32>
    %c78 = arith.constant 78 : index
    %c0_11 = arith.constant 0 : index
    %10 = vector.load %arg2[%c78, %c0_11] : memref<88x128xf32, #tpu.memory_space<vmem>>, vector<1x128xf32>
    %c79 = arith.constant 79 : index
    %c0_12 = arith.constant 0 : index
    %11 = vector.load %arg2[%c79, %c0_12] : memref<88x128xf32, #tpu.memory_space<vmem>>, vector<1x128xf32>
    %c80 = arith.constant 80 : index
    %c0_13 = arith.constant 0 : index
    %12 = vector.load %arg2[%c80, %c0_13] : memref<88x128xf32, #tpu.memory_space<vmem>>, vector<1x128xf32>
    %cst = arith.constant dense<0.000000e+00> : vector<8x128xf32>
    %13 = tpu.matmul %0, %1, %cst {dimension_numbers = #tpu.dot_dimension_numbers<[1], [0], [0], [1], [0, 0, 1, 1], [], []>} : vector<8x8xf32>, vector<8x128xf32>, vector<8x128xf32> -> vector<8x128xf32>
    %14 = vector.broadcast %4 : vector<1x128xf32> to vector<8x128xf32>
    %15 = arith.addf %13, %14 : vector<8x128xf32>
    %cst_14 = arith.constant dense<0.000000e+00> : vector<8xf32>
    %16 = vector.multi_reduction <add>, %15, %cst_14 [1] : vector<8x128xf32> to vector<8xf32>
    %17 = vector.shape_cast %16 : vector<8xf32> to vector<8x1xf32>
    %18 = arith.mulf %15, %15 : vector<8x128xf32>
    %cst_15 = arith.constant dense<0.000000e+00> : vector<8xf32>
    %19 = vector.multi_reduction <add>, %18, %cst_15 [1] : vector<8x128xf32> to vector<8xf32>
    %20 = vector.shape_cast %19 : vector<8xf32> to vector<8x1xf32>
    %cst_16 = arith.constant 3.125000e-02 : f32
    %21 = vector.broadcast %cst_16 : f32 to vector<8x1xf32>
    %22 = arith.mulf %17, %21 : vector<8x1xf32>
    %cst_17 = arith.constant 3.125000e-02 : f32
    %23 = vector.broadcast %cst_17 : f32 to vector<8x1xf32>
    %24 = arith.mulf %20, %23 : vector<8x1xf32>
    %25 = arith.mulf %22, %22 : vector<8x1xf32>
    %26 = arith.subf %24, %25 : vector<8x1xf32>
    %27 = vector.broadcast %22 : vector<8x1xf32> to vector<8x128xf32>
    %28 = arith.subf %15, %27 : vector<8x128xf32>
    %cst_18 = arith.constant 9.99999974E-6 : f32
    %29 = vector.broadcast %cst_18 : f32 to vector<8x1xf32>
    %30 = arith.addf %26, %29 : vector<8x1xf32>
    %31 = math.rsqrt %30 : vector<8x1xf32>
    %32 = vector.broadcast %31 : vector<8x1xf32> to vector<8x128xf32>
    %33 = arith.mulf %28, %32 : vector<8x128xf32>
    %34 = vector.broadcast %5 : vector<1x128xf32> to vector<8x128xf32>
    %35 = arith.mulf %33, %34 : vector<8x128xf32>
    %36 = vector.broadcast %6 : vector<1x128xf32> to vector<8x128xf32>
    %37 = arith.addf %35, %36 : vector<8x128xf32>
    %cst_19 = arith.constant 0.000000e+00 : f32
    %38 = vector.broadcast %cst_19 : f32 to vector<8x128xf32>
    %39 = arith.maximumf %37, %38 : vector<8x128xf32>
    %40 = vector.extract_strided_slice %39 {offsets = [0, 0], sizes = [8, 32], strides = [1, 1]} : vector<8x128xf32> to vector<8x32xf32>
    %cst_20 = arith.constant dense<0.000000e+00> : vector<8x128xf32>
    %41 = tpu.matmul %40, %2, %cst_20 {dimension_numbers = #tpu.dot_dimension_numbers<[1], [0], [0], [1], [0, 0, 1, 1], [], []>} : vector<8x32xf32>, vector<32x128xf32>, vector<8x128xf32> -> vector<8x128xf32>
    %42 = vector.broadcast %7 : vector<1x128xf32> to vector<8x128xf32>
    %43 = arith.addf %41, %42 : vector<8x128xf32>
    %cst_21 = arith.constant dense<0.000000e+00> : vector<8xf32>
    %44 = vector.multi_reduction <add>, %43, %cst_21 [1] : vector<8x128xf32> to vector<8xf32>
    %45 = vector.shape_cast %44 : vector<8xf32> to vector<8x1xf32>
    %46 = arith.mulf %43, %43 : vector<8x128xf32>
    %cst_22 = arith.constant dense<0.000000e+00> : vector<8xf32>
    %47 = vector.multi_reduction <add>, %46, %cst_22 [1] : vector<8x128xf32> to vector<8xf32>
    %48 = vector.shape_cast %47 : vector<8xf32> to vector<8x1xf32>
    %cst_23 = arith.constant 3.125000e-02 : f32
    %49 = vector.broadcast %cst_23 : f32 to vector<8x1xf32>
    %50 = arith.mulf %45, %49 : vector<8x1xf32>
    %cst_24 = arith.constant 3.125000e-02 : f32
    %51 = vector.broadcast %cst_24 : f32 to vector<8x1xf32>
    %52 = arith.mulf %48, %51 : vector<8x1xf32>
    %53 = arith.mulf %50, %50 : vector<8x1xf32>
    %54 = arith.subf %52, %53 : vector<8x1xf32>
    %55 = vector.broadcast %50 : vector<8x1xf32> to vector<8x128xf32>
    %56 = arith.subf %43, %55 : vector<8x128xf32>
    %cst_25 = arith.constant 9.99999974E-6 : f32
    %57 = vector.broadcast %cst_25 : f32 to vector<8x1xf32>
    %58 = arith.addf %54, %57 : vector<8x1xf32>
    %59 = math.rsqrt %58 : vector<8x1xf32>
    %60 = vector.broadcast %59 : vector<8x1xf32> to vector<8x128xf32>
    %61 = arith.mulf %56, %60 : vector<8x128xf32>
    %62 = vector.broadcast %8 : vector<1x128xf32> to vector<8x128xf32>
    %63 = arith.mulf %61, %62 : vector<8x128xf32>
    %64 = vector.broadcast %9 : vector<1x128xf32> to vector<8x128xf32>
    %65 = arith.addf %63, %64 : vector<8x128xf32>
    %cst_26 = arith.constant 0.000000e+00 : f32
    %66 = vector.broadcast %cst_26 : f32 to vector<8x128xf32>
    %67 = arith.maximumf %65, %66 : vector<8x128xf32>
    %68 = vector.extract_strided_slice %67 {offsets = [0, 0], sizes = [8, 32], strides = [1, 1]} : vector<8x128xf32> to vector<8x32xf32>
    %cst_27 = arith.constant dense<0.000000e+00> : vector<8x128xf32>
    %69 = tpu.matmul %68, %3, %cst_27 {dimension_numbers = #tpu.dot_dimension_numbers<[1], [0], [0], [1], [0, 0, 1, 1], [], []>} : vector<8x32xf32>, vector<32x128xf32>, vector<8x128xf32> -> vector<8x128xf32>
    %70 = vector.broadcast %10 : vector<1x128xf32> to vector<8x128xf32>
    %71 = arith.addf %69, %70 : vector<8x128xf32>
    %72 = math.tanh %71 : vector<8x128xf32>
    %73 = vector.broadcast %11 : vector<1x128xf32> to vector<8x128xf32>
    %74 = arith.mulf %72, %73 : vector<8x128xf32>
    %75 = vector.broadcast %12 : vector<1x128xf32> to vector<8x128xf32>
    %76 = arith.addf %74, %75 : vector<8x128xf32>
    %77 = vector.extract_strided_slice %76 {offsets = [0, 0], sizes = [8, 2], strides = [1, 1]} : vector<8x128xf32> to vector<8x2xf32>
    %c0_28 = arith.constant 0 : index
    %c0_29 = arith.constant 0 : index
    %78 = vector.load %arg3[%c0_28, %c0_29] : memref<8x2xf32, #tpu.memory_space<vmem>>, vector<8x2xf32>
    tpu.vector_store %arg3[%c0_28, %c0_29], %77 {strides = array<i32>} : memref<8x2xf32, #tpu.memory_space<vmem>>, vector<8x2xf32>,
    return
  }
  func.func @transform_0(%arg0: i32) -> (i32, i32) {
    %c0_i32 = arith.constant 0 : i32
    %c0_i32_0 = arith.constant 0 : i32
    return %arg0, %c0_i32 : i32, i32
  }
  func.func @transform_1(%arg0: i32) -> (i32, i32) {
    %c0_i32 = arith.constant 0 : i32
    %c0_i32_0 = arith.constant 0 : i32
    %c0_i32_1 = arith.constant 0 : i32
    return %c0_i32, %c0_i32_0 : i32, i32
  }
  func.func @transform_2(%arg0: i32) -> (i32, i32) {
    %c0_i32 = arith.constant 0 : i32
    %c0_i32_0 = arith.constant 0 : i32
    return %arg0, %c0_i32 : i32, i32
  }
}

</mosaic_0001>

<bundles_post_ra>
// kernel: actor_forward.1
= control target key start
LH: loop header
LB: loop body
LE: loop exit
PB: predicated region body
PF: predicated region fallthrough
CT: control target
= control target key end

     0   :  { %7 = vsyncpa [#allocation3], 0  ;;  %s442_s9 = smov [#allocation2]   ;;  %s483_s0 = inlined_call_operand.vmem [shape: f32[8,8], index: 0, kind: input, shape index: {}]   ;;  %s484_s1 = inlined_call_operand.hbm [shape: f32[88,128], index: 1, kind: input, shape index: {}]   ;;  %s485_s2 = inlined_call_operand.vmem [shape: f32[8,2], index: 2, kind: output, shape index: {}]  }
   0x1   :  { %s15_s10 = sshll.u32 %s442_s9, 4  ;;  %s418_s13 = scalar_lea.hbm %s484_s1, 1408  ;;  %s16_s10 = int_to_ptr.vmem [resolvable:$true] %s15_s10 }
   0x2   :  { %p419_p0 = scmp.ne.s32.totalorder %s484_s1, %s418_s13  ;;  %p422_p1 = scmp.lt.u32.totalorder %s418_s13, %s484_s1 }
   0x4   :  { %p424_p2 = pnand %p422_p1, %p419_p0 }
   0x6   :  { %427 = shalt.err (!%p424_p2)
}
   0x7   :  { %s428_s18 = scalar_lea.vmem %s16_s10, 1408  ;;  %p433_p4 = scmp.lt.s32.totalorder %s16_s10, %s16_s10 }
   0x8   :  { %p429_p3 = scmp.ne.s32.totalorder %s16_s10, %s428_s18  ;;  %p434_p5 = scmp.lt.s32.totalorder %s428_s18, %s428_s18 }
   0xa   :  { %p435_p6 = por %p434_p5, %p433_p4 }
   0xc   :  { %p436_p7 = pnand %p435_p6, %p429_p3 }
   0xe   :  { %439 = shalt.err (!%p436_p7)
}
   0xf   :  { %s443_s19 = smov 128   ;;  %s444_s20 = smov 8  }
  0x10   :  { %21 = dma.hbm_to_vmem [thread:$0]  %s484_s1, 1408, %s16_s10, [#allocation3], %s443_s19, %s443_s19, %s444_s20  }
  0x11   :  { %440 = dma.done.wait [#allocation3], 1408  }
  0x12   :  { %441 = vsyncadd [#allocation3], 4294965888  ;;  %v445_v0 = vmov 0.0   ;;  %vm446_vm0 = vmmov 0   ;;  %vm48_vm1 = vcmask 64512   ;;  %v26_v1 = vld [vmem:[#allocation2] sm:$0xff] }
  0x13   :  { %367 = vmatprep.subr.mxu0 %v445_v0  ;;  %369 = vmatprep.mubr.msk.f32.mxu0 %vm446_vm0, %v445_v0  ;;  %v25_v2 = vld [vmem:[%s483_s0] sm:$0xff]  ;;  %v343_v3 = vld [vmem:[#allocation2 + $0x48] ss:$0 sm:$0xff]  ;;  %v28_v9 = vld [vmem:[#allocation2 + $0x10] sm:$0xff]  ;;  %v447_v11 = vmov 0.0|0.0   ;;  %vm150_vm2 = vcmask 261120  }
  0x14   :  { %380 = vmatprep.mubr.msk.f32.mxu1 %vm446_vm0, %v445_v0  ;;  %368 = vmatpush3.msra.mxu0 %v26_v1  ;;  %v27_v8 = vld [vmem:[#allocation2 + $0x8] sm:$0xff]  ;;  %v29_v10 = vld [vmem:[#allocation2 + $0x18] sm:$0xff]  ;;  %v30_v13 = vld [vmem:[#allocation2 + $0x20] sm:$0xff]  ;;  %vm336_vm3 = vcmask 15360  }
  0x15   :  { %370 = vmatmul.mubr.msk.f32.vlgmr.msra.gmra.mrb[0].mxu0 %vm48_vm1, %v25_v2  ;;  %394 = vmatprep.subr.bf16.mxu1 %v447_v11  ;;  %v395_v12 = vpack.c.bf16 %v28_v9, %v27_v8  ;;  %v398_v14 = vpack.c.bf16 %v30_v13, %v29_v10  ;;  %v345_v24 = vld [vmem:[#allocation2 + $0x49] ss:$0 sm:$0xff]  ;;  %v346_v26 = vld [vmem:[#allocation2 + $0x4a] ss:$0 sm:$0xff]  ;;  %v347_v30 = vld [vmem:[#allocation2 + $0x4b] ss:$0 sm:$0xff] }
  0x16   :  { %391 = vmatprep.mubr.msk.f32.mxu0 %vm446_vm0, %v445_v0  ;;  %400 = vmatprep.subr.bf16.mxu0 %v447_v11  ;;  %v31_v35 = vld [vmem:[#allocation2 + $0x28] sm:$0xff]  ;;  %v32_v36 = vld [vmem:[#allocation2 + $0x30] sm:$0xff]  ;;  %v33_v38 = vld [vmem:[#allocation2 + $0x38] sm:$0xff] }
  0x17   :  { %396 = vmatpush3.bf16.msra.mxu1 %v395_v12  ;;  %v401_v37 = vpack.c.bf16 %v32_v36, %v31_v35  ;;  %v34_v39 = vld [vmem:[#allocation2 + $0x40] sm:$0xff]  ;;  %v349_v50 = vld [vmem:[#allocation2 + $0x4c] ss:$0 sm:$0xff]  ;;  %v350_v52 = vld [vmem:[#allocation2 + $0x4d] ss:$0 sm:$0xff] }
  0x18   :  { %397 = vmatprep.subr.bf16.mxu1 %v447_v11  ;;  %v404_v40 = vpack.c.bf16 %v34_v39, %v33_v38  ;;  %v351_v56 = vld [vmem:[#allocation2 + $0x4e] ss:$0 sm:$0xff]  ;;  %v353_v60 = vld [vmem:[#allocation2 + $0x4f] ss:$0 sm:$0xff]  ;;  %v354_v62 = vld [vmem:[#allocation2 + $0x50] ss:$0 sm:$0xff] }
  0x19   :  { %402 = vmatpush3.bf16.msra.mxu0 %v401_v37 }
  0x1a   :  { %403 = vmatprep.subr.bf16.mxu0 %v447_v11 }
  0x1b   :  { %399 = vmatpush3.bf16.msra.mxu1 %v398_v14 }
  0x1d   :  { %405 = vmatpush3.bf16.msra.mxu0 %v404_v40 }
  0xe8   :  { %v118_v4 = vpop.f32.mrb[0].mxu0 }
  0xe9   :  { %v119_v5 = vadd.f32 %v343_v3, %v118_v4  ;;  %v371_v6 = vpop.f32.mrb[1].mxu0 }
  0xeb   :  { %122 = vadd.xlane.f32.xlu0 %v119_v5  ;;  %v124_v7 = vmul.f32 %v119_v5, %v119_v5 }
  0xef   :  { %125 = vadd.xlane.f32.xlu0 %v124_v7 }
 0x178   :  { %v123_v15 = vpop.xlane.xlu0 %122 }
 0x179   :  { %v127_v16 = vmul.f32 0.03125, %v123_v15 }
 0x17b   :  { %v129_v18 = vmul.f32 %v127_v16, %v127_v16  ;;  %v131_v22 = vsub.f32 %v119_v5, %v127_v16 }
 0x17c   :  { %v126_v17 = vpop.xlane.xlu0 %125 }
 0x17d   :  { %v128_v19 = vmul.f32 0.03125, %v126_v17 }
 0x17f   :  { %v130_v20 = vsub.f32 %v128_v19, %v129_v18 }
 0x181   :  { %v132_v21 = vadd.f32 1e-05, %v130_v20 }
 0x183   :  { %412 = vrsqrt.f32 %v132_v21 }
 0x18d   :  { %v413_v23 = vpop.eup %412 }
 0x18e   :  { %v134_v25 = vmul.f32 %v413_v23, %v131_v22 }
 0x190   :  { %v139_v27 = vmul.f32 %v345_v24, %v134_v25 }
 0x192   :  { %v144_v28 = vadd.f32 %v346_v26, %v139_v27 }
 0x194   :  { %v145_v29 = vmax.f32 %v144_v28, 0.0 }
 0x196   :  { %381 = vmatmul.mubr.msk.f32.vlgmr.msra.gmra.mrb[0].mxu1 %vm150_vm2, %v145_v29 }
 0x269   :  { %v220_v31 = vpop.f32.mrb[0].mxu1 }
 0x26a   :  { %v221_v32 = vadd.f32 %v347_v30, %v220_v31  ;;  %v382_v33 = vpop.f32.mrb[1].mxu1 }
 0x26c   :  { %224 = vadd.xlane.f32.xlu1 %v221_v32  ;;  %v226_v34 = vmul.f32 %v221_v32, %v221_v32 }
 0x270   :  { %227 = vadd.xlane.f32.xlu1 %v226_v34 }
 0x2f9   :  { %v225_v41 = vpop.xlane.xlu1 %224 }
 0x2fa   :  { %v229_v42 = vmul.f32 0.03125, %v225_v41 }
 0x2fc   :  { %v231_v44 = vmul.f32 %v229_v42, %v229_v42  ;;  %v233_v48 = vsub.f32 %v221_v32, %v229_v42 }
 0x2fd   :  { %v228_v43 = vpop.xlane.xlu1 %227 }
 0x2fe   :  { %v230_v45 = vmul.f32 0.03125, %v228_v43 }
 0x300   :  { %v232_v46 = vsub.f32 %v230_v45, %v231_v44 }
 0x302   :  { %v234_v47 = vadd.f32 1e-05, %v232_v46 }
 0x304   :  { %414 = vrsqrt.f32 %v234_v47 }
 0x30e   :  { %v415_v49 = vpop.eup %414 }
 0x30f   :  { %v236_v51 = vmul.f32 %v415_v49, %v233_v48 }
 0x311   :  { %v241_v53 = vmul.f32 %v349_v50, %v236_v51 }
 0x313   :  { %v246_v54 = vadd.f32 %v350_v52, %v241_v53 }
 0x315   :  { %v247_v55 = vmax.f32 %v246_v54, 0.0 }
 0x317   :  { %392 = vmatmul.mubr.msk.f32.vlgmr.msra.gmra.mrb[2].mxu0 %vm150_vm2, %v247_v55 }
 0x3ea   :  { %v321_v57 = vpop.f32.mrb[2].mxu0 }
 0x3eb   :  { %v322_v58 = vadd.f32 %v351_v56, %v321_v57  ;;  %v393_v59 = vpop.f32.mrb[3].mxu0 }
 0x3ed   :  { %416 = vtanh.f32 %v322_v58 }
 0x3f7   :  { %v417_v61 = vpop.eup %416 }
 0x3f8   :  { %v330_v63 = vmul.f32 %v417_v61, %v353_v60 }
 0x3fa   :  { %v335_v0 = vadd.f32 %v354_v62, %v330_v63 }
 0x3fc   :  { %337 = vst.msk [vmem:[%s485_s2] sm:$0xff] %vm336_vm3, %v335_v0 }
 0x3fd   :  { %342 = vsyncpa [#allocation3], 1 }

</bundles_post_ra>
